<compile_context>
chip_gen: v5e
topology: v5e:2x2
jax: 0.10.0
libtpu: 0.0.40
codegen_flags: <defaults>
</compile_context>

<pallas_src>
import functools
import math

import jax
import jax.numpy as jnp
from jax.experimental import pallas as pl
from jax.experimental.pallas import tpu as pltpu


def _focal_loss_kernel(x_ref, t_ref, out_ref, *,
                       gamma, alpha, num_classes, s_blk, hw_valid, need_mask):
    """One grid step: (Nb, C, s_blk, 128) logits + (Nb, s_blk, 128) targets.

    The output block (1, 8, 128) is resident across the spatial grid axis and
    acts as the accumulator.
    """
    h = pl.program_id(1)
    nh = pl.num_programs(1)

    # Reset the resident accumulator at the start of each spatial sweep.
    @pl.when(h == 0)
    def _():
        out_ref[...] = jnp.zeros_like(out_ref)

    t = t_ref[...]                                      # (Nb, s_blk, 128) int32

    # ---- Unrolled class loop, pass 1: running max (pure VPU, dense vregs). --
    m = x_ref[:, 0].astype(jnp.float32)                 # (Nb, s_blk, 128)
    for c in range(1, num_classes):
        m = jnp.maximum(m, x_ref[:, c].astype(jnp.float32))

    # ---- Pass 2: exp-accumulate + one-hot selects (alpha fused in). ---------
    sum_exp = None
    z_t = jnp.zeros_like(m)      # z at the target class
    e_t = jnp.zeros_like(m)      # exp(z) at the target class (reused for pt)
    a_t = jnp.zeros_like(m) if alpha is not None else None
    for c in range(num_classes):
        z_c = x_ref[:, c].astype(jnp.float32) - m
        e_c = jnp.exp(z_c)
        sum_exp = e_c if sum_exp is None else sum_exp + e_c
        sel = t == c
        z_t = jnp.where(sel, z_c, z_t)
        e_t = jnp.where(sel, e_c, e_t)
        if alpha is not None:
            a_t = jnp.where(sel, jnp.float32(alpha[c]), a_t)

    # log_softmax at the target class; pt without an extra exp.
    logpt = z_t - jnp.log(sum_exp)
    pt = e_t * pl.reciprocal(sum_exp, approx=False)

    if alpha is not None:
        logpt = logpt * a_t

    # Focal factor with gamma specialization (avoid the EUP pow when possible).
    if gamma == 0.0:
        loss = -logpt
    elif float(gamma).is_integer() and 0 < gamma <= 8:
        omp = 1.0 - pt
        f = omp
        for _ in range(int(gamma) - 1):
            f = f * omp
        loss = -f * logpt
    else:
        omp = jnp.maximum(1.0 - pt, 0.0)   # clamp: rounding can make pt > 1
        loss = -(omp ** gamma) * logpt     # (Nb, s_blk, 128)

    def _accum(l):
        # Dense VALU reduction to an (8, 128) tile; no cross-lane reduce here.
        out_ref[...] += l.reshape(1, -1, 8, 128).sum(axis=1)

    if need_mask:
        # Padded / ragged columns only ever live in the last spatial block.
        @pl.when(h < nh - 1)
        def _():
            _accum(loss)

        @pl.when(h == nh - 1)
        def _():
            s_loc = jax.lax.broadcasted_iota(jnp.int32, loss.shape, 1)
            lane = jax.lax.broadcasted_iota(jnp.int32, loss.shape, 2)
            col = (h * s_blk + s_loc) * 128 + lane
            # NOTE: mask BEFORE the reduce — padded/ragged columns may hold
            # garbage (even NaN/Inf); jnp.where picks the 0.0 literal anyway.
            _accum(jnp.where(col < hw_valid, loss, 0.0))
    else:
        _accum(loss)


def _vmem_capacity_bytes():
    try:
        return int(pltpu.get_tpu_info().vmem_capacity_bytes)
    except Exception:
        return 64 * 1024 * 1024   # conservative: v7x per-TensorCore VMEM


def focal_loss(logits, target, *, gamma=0.0, alpha=None, size_average=True,
               max_tile_cols=256 * 1024):
    """Pallas TPU FocalLoss forward matching the PyTorch module semantics."""
    N, C = int(logits.shape[0]), int(logits.shape[1])
    HW = 1
    for d in logits.shape[2:]:
        HW *= int(d)

    # alpha handling mirrors __init__: float -> [a, 1-a]; list -> per-class.
    if alpha is None:
        alpha_vals = None
    elif isinstance(alpha, (float, int)):
        alpha_vals = (float(alpha), 1.0 - float(alpha))
    else:
        alpha_vals = tuple(float(a) for a in alpha)
    if alpha_vals is not None:
        assert len(alpha_vals) == C, "alpha gather requires len(alpha) == C"

    # Narrow float logits are streamed as-is (upcast in-register); anything
    # exotic is widened to f32.
    if logits.dtype not in (jnp.float32, jnp.bfloat16, jnp.float16):
        logits = logits.astype(jnp.float32)

    x = logits.reshape(N, C, HW)
    t = target.reshape(N, HW).astype(jnp.int32)

    # Pad the spatial axis to a multiple of 8*128 so it maps onto dense
    # (sublane, lane) tiles; padded columns are masked in-kernel.
    HW_pad = ((HW + 1023) // 1024) * 1024
    if HW_pad != HW:
        x = jnp.pad(x, ((0, 0), (0, 0), (0, HW_pad - HW)))
        t = jnp.pad(t, ((0, 0), (0, HW_pad - HW)))
    S = HW_pad // 128                       # multiple of 8
    x = x.reshape(N, C, S, 128)
    t = t.reshape(N, S, 128)

    # --- Tile sizing: per-generation VMEM budget, sublane-padding aware. ----
    vmem_cap = _vmem_capacity_bytes()
    bytes_per_col = C * x.dtype.itemsize + t.dtype.itemsize   # streamed bytes
    # double-buffered inputs + ~12 f32 compiler temporaries per column from
    # the unrolled class loop.
    per_col_vmem = 2 * bytes_per_col + 48
    budget_cols = int(vmem_cap * 0.55) // per_col_vmem
    budget_cols = max(1024, (budget_cols // 1024) * 1024)
    tile_cols = min(int(max_tile_cols), budget_cols)

    cols_img = HW_pad
    if cols_img > tile_cols:
        # Tile the spatial axis of a single image.
        nb = 1
        s_blk = max(8, (tile_cols // 128) // 8 * 8)
        if s_blk >= 32:
            s_blk = (s_blk // 32) * 32      # narrow-dtype friendly
        n_h = pl.cdiv(S, s_blk)
    else:
        # Whole image fits: block several images per step so each grid step
        # still moves a meaningful amount of data (overhead amortization).
        s_blk = S
        n_h = 1
        nb_cap = max(1, tile_cols // cols_img)
        if N > 1:
            nb_cap = min(nb_cap, max(1, N // 2))   # keep >=2 parallel steps
        nb = 1
        for d in range(min(N, nb_cap), 0, -1):
            if N % d == 0:
                nb = d
                break
    g0 = N // nb
    need_mask = (HW_pad != HW) or (S % s_blk != 0)

    kernel = functools.partial(
        _focal_loss_kernel,
        gamma=float(gamma), alpha=alpha_vals, num_classes=C,
        s_blk=s_blk, hw_valid=HW, need_mask=need_mask)

    partials = pl.pallas_call(
        kernel,
        out_shape=jax.ShapeDtypeStruct((g0, 8, 128), jnp.float32),
        grid_spec=pltpu.PrefetchScalarGridSpec(
            num_scalar_prefetch=0,
            grid=(g0, n_h),
            in_specs=[
                pl.BlockSpec((nb, C, s_blk, 128), lambda n, h: (n, 0, h, 0)),
                pl.BlockSpec((nb, s_blk, 128), lambda n, h: (n, h, 0)),
            ],
            out_specs=pl.BlockSpec((1, 8, 128), lambda n, h: (n, 0, 0)),
        ),
        compiler_params=pltpu.CompilerParams(
            dimension_semantics=("parallel", "arbitrary"),
            vmem_limit_bytes=int(vmem_cap * 0.85)),
    )(x, t)

    total = jnp.sum(partials)
    if size_average:
        total = total / jnp.float32(N * HW)
    return total


def _focal_loss_ref(logits_nchw, target, *, gamma, alpha_vec, size_average):
    """Pure-JAX reference mirroring the PyTorch forward (for verification)."""
    N, C = logits_nchw.shape[0], logits_nchw.shape[1]
    x = jnp.transpose(logits_nchw.reshape(N, C, -1), (0, 2, 1)).reshape(-1, C)
    x = x.astype(jnp.float32)
    t = target.reshape(-1).astype(jnp.int32)
    logp = jax.nn.log_softmax(x, axis=1)
    logpt = jnp.take_along_axis(logp, t[:, None], axis=1)[:, 0]
    pt = jnp.exp(logpt)
    if alpha_vec is not None:
        logpt = logpt * alpha_vec[t]
    loss = -((1.0 - pt) ** gamma) * logpt
    return loss.mean() if size_average else loss.sum()


if __name__ == "__main__":
    key = jax.random.PRNGKey(0)
    k1, k2, k3, k4, k5, k6 = jax.random.split(key, 6)

    # Case 1: small NCHW, per-class alpha list, gamma=2 (integer fast path),
    # mean reduction.  HW=256 -> padded to 1024, single block per image.
    N, C, H, W = 2, 4, 16, 16
    logits = jax.random.normal(k1, (N, C, H, W), dtype=jnp.float32)
    target = jax.random.randint(k2, (N, 1, H, W), 0, C, dtype=jnp.int32)
    alpha = [0.25, 0.5, 0.75, 1.0]
    out = focal_loss(logits, target, gamma=2.0, alpha=alpha, size_average=True)
    out = jax.block_until_ready(out)
    ref = _focal_loss_ref(logits, target, gamma=2.0,
                          alpha_vec=jnp.asarray(alpha, jnp.float32),
                          size_average=True)
    assert jnp.allclose(out, ref, rtol=1e-5, atol=1e-6), (out, ref)

    # Case 2: spatial tiling path with a ragged/padded tail (exercises the
    # last-step mask), no alpha, non-integer gamma, sum reduction.
    # HW=2304 -> padded to 3072 -> S=24; max_tile_cols=2048 -> s_blk=16, n_h=2.
    N2, C2, H2, W2 = 2, 4, 48, 48
    logits2 = jax.random.normal(k3, (N2, C2, H2, W2), dtype=jnp.float32)
    target2 = jax.random.randint(k4, (N2, 1, H2, W2), 0, C2, dtype=jnp.int32)
    out2 = focal_loss(logits2, target2, gamma=1.5, alpha=None,
                      size_average=False, max_tile_cols=2048)
    out2 = jax.block_until_ready(out2)
    ref2 = _focal_loss_ref(logits2, target2, gamma=1.5, alpha_vec=None,
                           size_average=False)
    assert jnp.allclose(out2, ref2, rtol=2e-5, atol=1e-3), (out2, ref2)

    # Case 3: multi-image blocking path (Nb>1), float alpha -> [a, 1-a],
    # gamma=0 path, bf16 logits (narrow streamed dtype), mean reduction.
    N3, C3, H3, W3 = 4, 2, 8, 8
    logits3 = jax.random.normal(k5, (N3, C3, H3, W3), dtype=jnp.float32)
    logits3 = logits3.astype(jnp.bfloat16)
    target3 = jax.random.randint(k6, (N3, 1, H3, W3), 0, C3, dtype=jnp.int32)
    out3 = focal_loss(logits3, target3, gamma=0.0, alpha=0.25,
                      size_average=True)
    out3 = jax.block_until_ready(out3)
    ref3 = _focal_loss_ref(logits3, target3, gamma=0.0,
                           alpha_vec=jnp.asarray([0.25, 0.75], jnp.float32),
                           size_average=True)
    assert jnp.allclose(out3, ref3, rtol=1e-4, atol=1e-5), (out3, ref3)

    print("KERNEL_OK")
</pallas_src>

<mosaic_0001>
module attributes {stable_mosaic.version = 11 : i64} {
  func.func @_focal_loss_kernel(%arg0: i32, %arg1: i32, %arg2: memref<1x4x8x128xf32, #tpu.memory_space<vmem>>, %arg3: memref<1x8x128xi32, #tpu.memory_space<vmem>>, %arg4: memref<1x8x128xf32, #tpu.memory_space<vmem>>) attributes {dimension_semantics = [#tpu.dimension_semantics<parallel>, #tpu.dimension_semantics<arbitrary>], iteration_bounds = array<i64: 2, 1>, scalar_prefetch = 0 : i64, scratch_operands = 0 : i64, tpu.core_type = #tpu.core_type<tc>, window_params = [{transform_indices = @transform_0, window_bounds = array<i64: 1, 4, 8, 128>}, {transform_indices = @transform_1, window_bounds = array<i64: 1, 8, 128>}, {transform_indices = @transform_2, window_bounds = array<i64: 1, 8, 128>}]} {
    %c0_i32 = arith.constant 0 : i32
    %0 = arith.cmpi eq, %arg1, %c0_i32 : i32
    %1 = arith.extui %0 : i1 to i32
    %c0_i32_0 = arith.constant 0 : i32
    %2 = arith.cmpi ne, %1, %c0_i32_0 : i32
    scf.if %2 {
      %cst_45 = arith.constant 0.000000e+00 : f32
      %78 = vector.broadcast %cst_45 : f32 to vector<1x8x128xf32>
      %c0_46 = arith.constant 0 : index
      %c0_47 = arith.constant 0 : index
      %c0_48 = arith.constant 0 : index
      %79 = vector.load %arg4[%c0_46, %c0_47, %c0_48] : memref<1x8x128xf32, #tpu.memory_space<vmem>>, vector<1x8x128xf32>
      tpu.vector_store %arg4[%c0_46, %c0_47, %c0_48], %78 {strides = array<i32>} : memref<1x8x128xf32, #tpu.memory_space<vmem>>, vector<1x8x128xf32>,
    } else {
    }
    %c0 = arith.constant 0 : index
    %c0_1 = arith.constant 0 : index
    %c0_2 = arith.constant 0 : index
    %3 = vector.load %arg3[%c0, %c0_1, %c0_2] : memref<1x8x128xi32, #tpu.memory_space<vmem>>, vector<1x8x128xi32>
    %c0_3 = arith.constant 0 : index
    %c0_4 = arith.constant 0 : index
    %c0_5 = arith.constant 0 : index
    %c0_6 = arith.constant 0 : index
    %4 = vector.load %arg2[%c0_3, %c0_4, %c0_5, %c0_6] : memref<1x4x8x128xf32, #tpu.memory_space<vmem>>, vector<1x1x8x128xf32>
    %5 = vector.shape_cast %4 : vector<1x1x8x128xf32> to vector<1x8x128xf32>
    %c0_7 = arith.constant 0 : index
    %c1 = arith.constant 1 : index
    %c0_8 = arith.constant 0 : index
    %c0_9 = arith.constant 0 : index
    %6 = vector.load %arg2[%c0_7, %c1, %c0_8, %c0_9] : memref<1x4x8x128xf32, #tpu.memory_space<vmem>>, vector<1x1x8x128xf32>
    %7 = vector.shape_cast %6 : vector<1x1x8x128xf32> to vector<1x8x128xf32>
    %8 = arith.maximumf %5, %7 : vector<1x8x128xf32>
    %c0_10 = arith.constant 0 : index
    %c2 = arith.constant 2 : index
    %c0_11 = arith.constant 0 : index
    %c0_12 = arith.constant 0 : index
    %9 = vector.load %arg2[%c0_10, %c2, %c0_11, %c0_12] : memref<1x4x8x128xf32, #tpu.memory_space<vmem>>, vector<1x1x8x128xf32>
    %10 = vector.shape_cast %9 : vector<1x1x8x128xf32> to vector<1x8x128xf32>
    %11 = arith.maximumf %8, %10 : vector<1x8x128xf32>
    %c0_13 = arith.constant 0 : index
    %c3 = arith.constant 3 : index
    %c0_14 = arith.constant 0 : index
    %c0_15 = arith.constant 0 : index
    %12 = vector.load %arg2[%c0_13, %c3, %c0_14, %c0_15] : memref<1x4x8x128xf32, #tpu.memory_space<vmem>>, vector<1x1x8x128xf32>
    %13 = vector.shape_cast %12 : vector<1x1x8x128xf32> to vector<1x8x128xf32>
    %14 = arith.maximumf %11, %13 : vector<1x8x128xf32>
    %cst = arith.constant 0.000000e+00 : f32
    %15 = vector.broadcast %cst : f32 to vector<1x8x128xf32>
    %cst_16 = arith.constant 0.000000e+00 : f32
    %16 = vector.broadcast %cst_16 : f32 to vector<1x8x128xf32>
    %cst_17 = arith.constant 0.000000e+00 : f32
    %17 = vector.broadcast %cst_17 : f32 to vector<1x8x128xf32>
    %c0_18 = arith.constant 0 : index
    %c0_19 = arith.constant 0 : index
    %c0_20 = arith.constant 0 : index
    %c0_21 = arith.constant 0 : index
    %18 = vector.load %arg2[%c0_18, %c0_19, %c0_20, %c0_21] : memref<1x4x8x128xf32, #tpu.memory_space<vmem>>, vector<1x1x8x128xf32>
    %19 = vector.shape_cast %18 : vector<1x1x8x128xf32> to vector<1x8x128xf32>
    %20 = arith.subf %19, %14 : vector<1x8x128xf32>
    %21 = math.exp %20 : vector<1x8x128xf32>
    %c0_i32_22 = arith.constant 0 : i32
    %22 = vector.broadcast %c0_i32_22 : i32 to vector<1x8x128xi32>
    %23 = arith.cmpi eq, %3, %22 : vector<1x8x128xi32>
    %24 = arith.select %23, %20, %15 : vector<1x8x128xi1>, vector<1x8x128xf32>
    %25 = arith.select %23, %21, %16 : vector<1x8x128xi1>, vector<1x8x128xf32>
    %cst_23 = arith.constant 2.500000e-01 : f32
    %26 = vector.broadcast %cst_23 : f32 to vector<1x8x128xf32>
    %27 = arith.select %23, %26, %17 : vector<1x8x128xi1>, vector<1x8x128xf32>
    %c0_24 = arith.constant 0 : index
    %c1_25 = arith.constant 1 : index
    %c0_26 = arith.constant 0 : index
    %c0_27 = arith.constant 0 : index
    %28 = vector.load %arg2[%c0_24, %c1_25, %c0_26, %c0_27] : memref<1x4x8x128xf32, #tpu.memory_space<vmem>>, vector<1x1x8x128xf32>
    %29 = vector.shape_cast %28 : vector<1x1x8x128xf32> to vector<1x8x128xf32>
    %30 = arith.subf %29, %14 : vector<1x8x128xf32>
    %31 = math.exp %30 : vector<1x8x128xf32>
    %32 = arith.addf %21, %31 : vector<1x8x128xf32>
    %c1_i32 = arith.constant 1 : i32
    %33 = vector.broadcast %c1_i32 : i32 to vector<1x8x128xi32>
    %34 = arith.cmpi eq, %3, %33 : vector<1x8x128xi32>
    %35 = arith.select %34, %30, %24 : vector<1x8x128xi1>, vector<1x8x128xf32>
    %36 = arith.select %34, %31, %25 : vector<1x8x128xi1>, vector<1x8x128xf32>
    %cst_28 = arith.constant 5.000000e-01 : f32
    %37 = vector.broadcast %cst_28 : f32 to vector<1x8x128xf32>
    %38 = arith.select %34, %37, %27 : vector<1x8x128xi1>, vector<1x8x128xf32>
    %c0_29 = arith.constant 0 : index
    %c2_30 = arith.constant 2 : index
    %c0_31 = arith.constant 0 : index
    %c0_32 = arith.constant 0 : index
    %39 = vector.load %arg2[%c0_29, %c2_30, %c0_31, %c0_32] : memref<1x4x8x128xf32, #tpu.memory_space<vmem>>, vector<1x1x8x128xf32>
    %40 = vector.shape_cast %39 : vector<1x1x8x128xf32> to vector<1x8x128xf32>
    %41 = arith.subf %40, %14 : vector<1x8x128xf32>
    %42 = math.exp %41 : vector<1x8x128xf32>
    %43 = arith.addf %32, %42 : vector<1x8x128xf32>
    %c2_i32 = arith.constant 2 : i32
    %44 = vector.broadcast %c2_i32 : i32 to vector<1x8x128xi32>
    %45 = arith.cmpi eq, %3, %44 : vector<1x8x128xi32>
    %46 = arith.select %45, %41, %35 : vector<1x8x128xi1>, vector<1x8x128xf32>
    %47 = arith.select %45, %42, %36 : vector<1x8x128xi1>, vector<1x8x128xf32>
    %cst_33 = arith.constant 7.500000e-01 : f32
    %48 = vector.broadcast %cst_33 : f32 to vector<1x8x128xf32>
    %49 = arith.select %45, %48, %38 : vector<1x8x128xi1>, vector<1x8x128xf32>
    %c0_34 = arith.constant 0 : index
    %c3_35 = arith.constant 3 : index
    %c0_36 = arith.constant 0 : index
    %c0_37 = arith.constant 0 : index
    %50 = vector.load %arg2[%c0_34, %c3_35, %c0_36, %c0_37] : memref<1x4x8x128xf32, #tpu.memory_space<vmem>>, vector<1x1x8x128xf32>
    %51 = vector.shape_cast %50 : vector<1x1x8x128xf32> to vector<1x8x128xf32>
    %52 = arith.subf %51, %14 : vector<1x8x128xf32>
    %53 = math.exp %52 : vector<1x8x128xf32>
    %54 = arith.addf %43, %53 : vector<1x8x128xf32>
    %c3_i32 = arith.constant 3 : i32
    %55 = vector.broadcast %c3_i32 : i32 to vector<1x8x128xi32>
    %56 = arith.cmpi eq, %3, %55 : vector<1x8x128xi32>
    %57 = arith.select %56, %52, %46 : vector<1x8x128xi1>, vector<1x8x128xf32>
    %58 = arith.select %56, %53, %47 : vector<1x8x128xi1>, vector<1x8x128xf32>
    %cst_38 = arith.constant 1.000000e+00 : f32
    %59 = vector.broadcast %cst_38 : f32 to vector<1x8x128xf32>
    %60 = arith.select %56, %59, %49 : vector<1x8x128xi1>, vector<1x8x128xf32>
    %61 = math.log %54 : vector<1x8x128xf32>
    %62 = arith.subf %57, %61 : vector<1x8x128xf32>
    %63 = tpu.reciprocal %54 : vector<1x8x128xf32> -> vector<1x8x128xf32>
    %64 = arith.mulf %58, %63 : vector<1x8x128xf32>
    %65 = arith.mulf %62, %60 : vector<1x8x128xf32>
    %cst_39 = arith.constant 1.000000e+00 : f32
    %66 = vector.broadcast %cst_39 : f32 to vector<1x8x128xf32>
    %67 = arith.subf %66, %64 : vector<1x8x128xf32>
    %68 = arith.mulf %67, %67 : vector<1x8x128xf32>
    %cst_40 = arith.constant 0.000000e+00 : f32
    %69 = vector.broadcast %cst_40 : f32 to vector<1x8x128xf32>
    %70 = arith.subf %69, %68 : vector<1x8x128xf32>
    %71 = arith.mulf %70, %65 : vector<1x8x128xf32>
    %c0_i32_41 = arith.constant 0 : i32
    %72 = arith.cmpi slt, %arg1, %c0_i32_41 : i32
    %73 = arith.extui %72 : i1 to i32
    %c0_i32_42 = arith.constant 0 : i32
    %74 = arith.cmpi ne, %73, %c0_i32_42 : i32
    scf.if %74 {
      %c0_45 = arith.constant 0 : index
      %c0_46 = arith.constant 0 : index
      %c0_47 = arith.constant 0 : index
      %78 = vector.load %arg4[%c0_45, %c0_46, %c0_47] : memref<1x8x128xf32, #tpu.memory_space<vmem>>, vector<1x8x128xf32>
      %79 = vector.shape_cast %71 : vector<1x8x128xf32> to vector<1x1x8x128xf32>
      %cst_48 = arith.constant dense<0.000000e+00> : vector<1x8x128xf32>
      %80 = vector.multi_reduction <add>, %79, %cst_48 [1] : vector<1x1x8x128xf32> to vector<1x8x128xf32>
      %81 = arith.addf %78, %80 : vector<1x8x128xf32>
      %c0_49 = arith.constant 0 : index
      %c0_50 = arith.constant 0 : index
      %c0_51 = arith.constant 0 : index
      %82 = vector.load %arg4[%c0_49, %c0_50, %c0_51] : memref<1x8x128xf32, #tpu.memory_space<vmem>>, vector<1x8x128xf32>
      tpu.vector_store %arg4[%c0_49, %c0_50, %c0_51], %81 {strides = array<i32>} : memref<1x8x128xf32, #tpu.memory_space<vmem>>, vector<1x8x128xf32>,
    } else {
    }
    %c0_i32_43 = arith.constant 0 : i32
    %75 = arith.cmpi eq, %arg1, %c0_i32_43 : i32
    %76 = arith.extui %75 : i1 to i32
    %c0_i32_44 = arith.constant 0 : i32
    %77 = arith.cmpi ne, %76, %c0_i32_44 : i32
    scf.if %77 {
      %78 = tpu.iota {dimensions = array<i32: 1>} : vector<1x8x128xi32>
      %79 = tpu.iota {dimensions = array<i32: 2>} : vector<1x8x128xi32>
      %c8_i32 = arith.constant 8 : i32
      %80 = arith.muli %arg1, %c8_i32 : i32
      %81 = vector.broadcast %80 : i32 to vector<1x8x128xi32>
      %82 = arith.addi %81, %78 : vector<1x8x128xi32>
      %c128_i32 = arith.constant 128 : i32
      %83 = vector.broadcast %c128_i32 : i32 to vector<1x8x128xi32>
      %84 = arith.muli %82, %83 : vector<1x8x128xi32>
      %85 = arith.addi %84, %79 : vector<1x8x128xi32>
      %c256_i32 = arith.constant 256 : i32
      %86 = vector.broadcast %c256_i32 : i32 to vector<1x8x128xi32>
      %87 = arith.cmpi slt, %85, %86 : vector<1x8x128xi32>
      %cst_45 = arith.constant 0.000000e+00 : f32
      %88 = vector.broadcast %cst_45 : f32 to vector<1x8x128xf32>
      %89 = arith.select %87, %71, %88 : vector<1x8x128xi1>, vector<1x8x128xf32>
      %c0_46 = arith.constant 0 : index
      %c0_47 = arith.constant 0 : index
      %c0_48 = arith.constant 0 : index
      %90 = vector.load %arg4[%c0_46, %c0_47, %c0_48] : memref<1x8x128xf32, #tpu.memory_space<vmem>>, vector<1x8x128xf32>
      %91 = vector.shape_cast %89 : vector<1x8x128xf32> to vector<1x1x8x128xf32>
      %cst_49 = arith.constant dense<0.000000e+00> : vector<1x8x128xf32>
      %92 = vector.multi_reduction <add>, %91, %cst_49 [1] : vector<1x1x8x128xf32> to vector<1x8x128xf32>
      %93 = arith.addf %90, %92 : vector<1x8x128xf32>
      %c0_50 = arith.constant 0 : index
      %c0_51 = arith.constant 0 : index
      %c0_52 = arith.constant 0 : index
      %94 = vector.load %arg4[%c0_50, %c0_51, %c0_52] : memref<1x8x128xf32, #tpu.memory_space<vmem>>, vector<1x8x128xf32>
      tpu.vector_store %arg4[%c0_50, %c0_51, %c0_52], %93 {strides = array<i32>} : memref<1x8x128xf32, #tpu.memory_space<vmem>>, vector<1x8x128xf32>,
    } else {
    }
    return
  }
  func.func @transform_0(%arg0: i32, %arg1: i32) -> (i32, i32, i32, i32) {
    %c0_i32 = arith.constant 0 : i32
    %c0_i32_0 = arith.constant 0 : i32
    %c0_i32_1 = arith.constant 0 : i32
    return %arg0, %c0_i32, %arg1, %c0_i32_0 : i32, i32, i32, i32
  }
  func.func @transform_1(%arg0: i32, %arg1: i32) -> (i32, i32, i32) {
    %c0_i32 = arith.constant 0 : i32
    %c0_i32_0 = arith.constant 0 : i32
    return %arg0, %arg1, %c0_i32 : i32, i32, i32
  }
  func.func @transform_2(%arg0: i32, %arg1: i32) -> (i32, i32, i32) {
    %c0_i32 = arith.constant 0 : i32
    %c0_i32_0 = arith.constant 0 : i32
    %c0_i32_1 = arith.constant 0 : i32
    return %arg0, %c0_i32, %c0_i32_0 : i32, i32, i32
  }
}

</mosaic_0001>

<bundles_post_ra>
// kernel: tpu_custom_call.1
= control target key start
LH: loop header
LB: loop body
LE: loop exit
PB: predicated region body
PF: predicated region fallthrough
CT: control target
= control target key end

     0   :  { %7 = vsyncpa [#allocation3], 0  ;;  %s857_s0 = inlined_call_operand.hbm [shape: f32[2,4,8,128], index: 0, kind: input, shape index: {}]   ;;  %s858_s1 = inlined_call_operand.hbm [shape: s32[2,8,128], index: 1, kind: input, shape index: {}]   ;;  %s859_s2 = inlined_call_operand.hbm [shape: f32[2,8,128], index: 2, kind: output, shape index: {}]  }
   0x1   :  { %9 = vsyncpa [#allocation3 + $0x1], 0 }
   0x2   :  { %10 = vsyncpa [#allocation6], 0 }
   0x3   :  { %12 = vsyncpa [#allocation6 + $0x1], 0 }
   0x4   :  { %13 = vsyncpa [#allocation4], 0 }
   0x5   :  { %15 = vsyncpa [#allocation4 + $0x1], 0  ;;  %s706_s9 = smov 0   ;;  %s708_s10 = smov 0  }
   0x6   :  { %s710_s11 = smov 0   ;;  %s712_s12 = smov 0  }
   0x7   :  { %s714_s13 = smov 0   ;;  %s716_s14 = smov 0  }
   0x8 LB: > { %s437_s15 = sadd.s32 4294967295, %s686_s14   ;;  %s438_s16 = sadd.s32 4294967294, %s686_s14   ;;  %s686_s14 = sphi %s716_s14, %s21_s14   ;;  %s682_s13 = sphi %s714_s13, %s869_s13   ;;  %s678_s12 = sphi %s712_s12, %s868_s12   ;;  %s674_s11 = sphi %s710_s11, %s867_s11   ;;  %s670_s10 = sphi %s708_s10, %s866_s10   ;;  %s666_s9 = sphi %s706_s9, %s865_s9  }
   0x9   : > { %s33_s17 = sadd.s32 1, %s682_s13  ;;  %s42_s18 = sadd.s32 1, %s674_s11 }
   0xa   : > { %p35_p0 = scmp.ge.s32.totalorder %s33_s17, 2  ;;  %p49_p1 = scmp.ne.s32.totalorder %s674_s11, %s670_s10 }
   0xb   : > { %p50_p2 = scmp.eq.s32.totalorder %s686_s14, 0  ;;  %p55_p3 = scmp.ne.s32.totalorder %s670_s10, %s666_s9 }
   0xc   : > { %s871_s17 = smov (%p35_p0, %s33_s17), 0  ;;  %p56_p5 = scmp.eq.s32.totalorder %s437_s15, 0 }
   0xd   : > { %p747_p4 = por %p50_p2, %p49_p1  ;;  %s37_s20 = ssub.s32 %s682_s13, %s871_s17 }
   0xe   : > { %p107_p6 = scmp.eq.s32.totalorder %s437_s15, 1  ;;  %p40_p7 = scmp.eq.s32.totalorder %s37_s20, 0 }
   0xf   : > { %p753_p8 = por %p56_p5, %p55_p3  ;;  %p113_p10 = scmp.eq.s32.totalorder %s438_s16, 1 }
  0x10   : > { %p757_p9 = por %p107_p6, %p49_p1  ;;  %p440_p12 = scmp.ge.s32.totalorder %s686_s14, 2 }
  0x11   : > { %s762_s23 = scalar_select %p40_p7, %s674_s11, %s42_s18  }
  0x12   : > { %p764_p11 = por %p113_p10, %p55_p3  ;;  %p475_p13 = scmp.lt.s32.totalorder %s686_s14, 2 }
  0x13   : > { %s133_s25 = sand.u32 1, %s674_s11   ;;  %s457_s27 = sshll.u32 %s682_s13, 5 }
  0x14   : > { %s441_s26 = sshll.u32 %s133_s25, 5  ;;  %s143_s30 = scalar_lea.hbm %s857_s0, %s457_s27 }
  0x15   : > { %s137_s3 = scalar_lea.vmem [#allocation2], %s441_s26  ;;  %s144_s5 = sshll.u32 %s143_s30, 4  ;;  %s145_s5 = int_to_ptr.hbm [resolvable:$true] %s144_s5 }
  0x16   : > { %s146_s4 = sshll.u32 %s137_s3, 4  ;;  %p777_p0 = pnand %p475_p13, %p747_p4  ;;  %s147_s4 = int_to_ptr.vmem [resolvable:$true] %s146_s4 }
  0x17   : > { %p446_p1 = scmp.ge.s32.totalorder %s686_s14, 1  ;;  %s134_s7 = scalar_lea.sflag [#allocation3], %s133_s25 }
  0x18   : > { %s688_s8 = smov 128   ;;  %s689_s15 = smov 8  }
  0x19   : > { %467 = dma.hbm_to_vmem [thread:$0]  (!%p777_p0), %s145_s5, 512, %s147_s4, %s134_s7, %s688_s8, %s688_s8, %s689_s15  }
  0x1a   : > { %p174_p2 = scmp.lt.s32.totalorder %s686_s14, 3  ;;  %s444_s16 = sshll.u32 %s133_s25, 3 }
  0x1b   : > { %s445_s18 = sshll.u32 %s682_s13, 3  ;;  %s160_s27 = scalar_lea.vmem [#allocation5], %s444_s16 }
  0x1c   : > { %p175_p3 = pnand %p446_p1, %p174_p2  ;;  %s165_s19 = scalar_lea.hbm %s858_s1, %s445_s18 }
  0x1d   : > { %s169_s28 = sshll.u32 %s160_s27, 4  ;;  %s167_s29 = sshll.u32 %s165_s19, 4  ;;  %s170_s28 = int_to_ptr.vmem [resolvable:$true] %s169_s28  ;;  %s168_s29 = int_to_ptr.hbm [resolvable:$true] %s167_s29 }
  0x1e   : > { %s157_s30 = scalar_lea.sflag [#allocation6], %s133_s25  ;;  %178 = sbr.rel (%p175_p3) target bundleno = 95 (0x5f), region = 28 }
  0x1f   : > { %470 = dma.hbm_to_vmem [thread:$0]  (!%p777_p0), %s168_s29, 128, %s170_s28, %s157_s30  }
  0x20   : > { %s792_s3 = sand.u32 (!%p175_p3), 1, %s670_s10  }
  0x21   : > { %s447_s4 = sshll.u32 (!%p175_p3), %s792_s3, 5  ;;  %s181_s5 = scalar_lea.sflag (!%p175_p3), [#allocation3], %s792_s3 }
  0x22   : > { %s184_s7 = scalar_lea.vmem (!%p175_p3), [#allocation2], %s447_s4 }
  0x23   : > { %653 = dma.done.wait (%p753_p8), %s181_s5, 512  }
  0x24   : > { %655 = vsyncadd (%p753_p8), %s181_s5, 4294966784  ;;  %s448_s25 = sshll.u32 %s792_s3, 3  ;;  %s191_s6 = scalar_lea.sflag [#allocation6], %s792_s3 }
  0x25   : > { %s194_s8 = scalar_lea.vmem [#allocation5], %s448_s25 }
  0x26   : > { %657 = dma.done.wait (%p753_p8), %s191_s6, 128  }
  0x27   : > { %659 = vsyncadd (%p753_p8), %s191_s6, 4294967168  ;;  %v227_v0 = vld [vmem:[%s184_s7] sm:$0xff]  ;;  %v450_v1 = vld [vmem:[%s184_s7 + $0x8] sm:$0xff]  ;;  %v690_v26 = vmov 0.0   ;;  %v302_v32 = vlaneseq  ;;  %s454_s21 = sshll.u32 %s678_s12, 3  ;;  %s220_s20 = scalar_lea.vmem [#allocation7], %s448_s25 }
  0x28   : > { %v230_v2 = vmax.f32 %v227_v0, %v450_v1  ;;  %v451_v3 = vld [vmem:[%s184_s7 + $0x10] sm:$0xff]  ;;  %v452_v4 = vld [vmem:[%s184_s7 + $0x18] sm:$0xff]  ;;  %v226_v22 = vld [vmem:[%s194_s8] sm:$0xff]  ;;  %s328_s18 = scalar_lea.hbm %s859_s2, %s454_s21  ;;  %s330_s26 = sshll.u32 %s220_s20, 4  ;;  %s331_s26 = int_to_ptr.vmem [resolvable:$true] %s330_s26 }
  0x29   : > { %vm240_vm0 = vcmp.eq.s32.totalorder %v226_v22, 0  ;;  %vm248_vm1 = vcmp.eq.s32.totalorder %v226_v22, 1  ;;  %vm256_vm2 = vcmp.eq.s32.totalorder %v226_v22, 2  ;;  %vm264_vm5 = vcmp.eq.s32.totalorder %v226_v22, 3  ;;  %s332_s19 = sshll.u32 %s328_s18, 4  ;;  %s318_s12 = scalar_lea.sflag [#allocation4], %s792_s3  ;;  %s333_s19 = int_to_ptr.hbm [resolvable:$true] %s332_s19 }
  0x2a   : > { %v233_v5 = vmax.f32 %v230_v2, %v451_v3  ;;  %v243_v27 = vsel %vm240_vm0, 0.25, %v690_v26  ;;  %v303_v41 = vshrl.u32 %v302_v32, 7  ;;  %v305_v49 = vand.u32 127, %v302_v32  ;;  %s614_s27 = sshra.s32 %s333_s19, 4  ;;  %s620_s4 = scalar_lea.hbm %s859_s2, 16  ;;  %s615_s27 = int_to_ptr.hbm [resolvable:$true] %s614_s27 }
  0x2b   : > { %v251_v39 = vsel %vm248_vm1, 0.5, %v243_v27  ;;  %s616_s28 = scalar_lea.hbm %s615_s27, 8  ;;  %p621_p7 = scmp.lt.s32.totalorder %s615_s27, %s859_s2 }
  0x2c   : > { %v236_v6 = vmax.f32 %v233_v5, %v452_v4  ;;  %v259_v46 = vsel %vm256_vm2, 0.75, %v251_v39  ;;  %v309_v50 = vmul.u32 128, %v303_v41  ;;  %p617_p4 = scmp.ne.s32.totalorder %s615_s27, %s616_s28  ;;  %p622_p8 = scmp.lt.s32.totalorder %s620_s4, %s616_s28 }
  0x2d   : > { %v267_v53 = vsel %vm264_vm5, 1.0, %v259_v46 }
  0x2e   : > { %v237_v7 = vsub.f32 %v227_v0, %v236_v6  ;;  %v244_v8 = vsub.f32 %v450_v1, %v236_v6  ;;  %v252_v9 = vsub.f32 %v451_v3, %v236_v6  ;;  %v260_v10 = vsub.f32 %v452_v4, %v236_v6  ;;  %p618_p5 = pnand %p617_p4, %p757_p9  ;;  %p623_p10 = por %p622_p8, %p621_p7 }
  0x2f   : > { %v310_v55 = vadd.s32 %v309_v50, %v305_v49 }
  0x30   : > { %v238_v11 = vmul.f32 1.442695, %v237_v7  ;;  %v245_v12 = vmul.f32 1.442695, %v244_v8  ;;  %v253_v13 = vmul.f32 1.442695, %v252_v9  ;;  %p619_p6 = pneg %p618_p5 }
  0x31   : > { %v261_v14 = vmul.f32 1.442695, %v260_v10  ;;  %v241_v23 = vsel %vm240_vm0, %v237_v7, 0.0  ;;  %vm311_vm8 = vcmp.lt.s32.totalorder %v310_v55, 256 }
  0x32   : > { %528 = vpow2.f32 %v238_v11  ;;  %v249_v29 = vsel %vm248_vm1, %v244_v8, %v241_v23  ;;  %p624_p13 = pnand %p623_p10, %p619_p6 }
  0x33   : > { %530 = vpow2.f32 %v245_v12  ;;  %v257_v36 = vsel %vm256_vm2, %v252_v9, %v249_v29 }
  0x34   : > { %532 = vpow2.f32 %v253_v13  ;;  %v265_v44 = vsel %vm264_vm5, %v260_v10, %v257_v36 }
  0x35   : > { %534 = vpow2.f32 %v261_v14 }
  0x38   : > { %v529_v15 = vpop.eup %528 }
  0x39   : > { %v531_v16 = vpop.eup %530  ;;  %v242_v24 = vsel %vm240_vm0, %v529_v15, 0.0 }
  0x3a   : > { %v533_v17 = vpop.eup %532  ;;  %v247_v18 = vadd.f32 %v531_v16, %v529_v15  ;;  %v250_v30 = vsel %vm248_vm1, %v531_v16, %v242_v24 }
  0x3b   : > { %v535_v19 = vpop.eup %534  ;;  %v258_v37 = vsel %vm256_vm2, %v533_v17, %v250_v30 }
  0x3c   : > { %v255_v20 = vadd.f32 %v533_v17, %v247_v18  ;;  %v266_v45 = vsel %vm264_vm5, %v535_v19, %v258_v37 }
  0x3e   : > { %v263_v21 = vadd.f32 %v535_v19, %v255_v20 }
  0x40   : > { %536 = vrcp.f32 %v263_v21  ;;  %v282_v31 = vand.u32 2147483648, %v263_v21  ;;  %vm276_vm3 = vweird.f32 %v263_v21  ;;  %v280_v34 = vand.u32 2147483647, %v263_v21 }
  0x41   : > { %538 = vlog2.f32 %v263_v21 }
  0x42   : > { %v283_v40 = vor.u32 1.1754944e-38, %v282_v31  ;;  %vm281_vm7 = vcmp.eq.f32.partialorder %v280_v34, 8.507059e+37 }
  0x46   : > { %v537_v25 = vpop.eup %536 }
  0x47   : > { %v272_v28 = vmul.f32 %v537_v25, %v263_v21  ;;  %vm277_vm4 = vweird.f32 %v537_v25  ;;  %v539_v35 = vpop.eup %538 }
  0x48   : > { %vm278_vm6 = vmor %vm276_vm3, %vm277_vm4  ;;  %v269_v42 = vmul.f32 0.6931472, %v539_v35 }
  0x49   : > { %v273_v33 = vsub.f32 1.0, %v272_v28 }
  0x4a   : > { %v270_v51 = vsub.f32 %v265_v44, %v269_v42 }
  0x4b   : > { %v274_v38 = vmul.f32 %v537_v25, %v273_v33 }
  0x4c   : > { %v286_v56 = vmul.f32 %v270_v51, %v267_v53 }
  0x4d   : > { %v275_v43 = vadd.f32 %v537_v25, %v274_v38 }
  0x4f   : > { %v279_v47 = vsel %vm278_vm6, %v537_v25, %v275_v43 }
  0x50   : > { %v284_v48 = vsel %vm281_vm7, %v283_v40, %v279_v47 }
  0x51   : > { %v285_v52 = vmul.f32 %v284_v48, %v266_v45 }
  0x53   : > { %v287_v54 = vsub.f32 1.0, %v285_v52 }
  0x55   : > { %v288_v57 = vmul.f32 %v287_v54, %v287_v54 }
  0x57   : > { %v289_v58 = vsub.f32 0.0, %v288_v57 }
  0x59   : > { %v290_v59 = vmul.f32 %v289_v58, %v286_v56 }
  0x5b   : > { %v312_v60 = vsel %vm311_vm8, %v290_v59, 0.0 }
  0x5c   : > { %316 = vst [vmem:[%s220_s20] sm:$0xff] %v312_v60 }
  0x5d   : > { %627 = shalt.err (!%p624_p13)
}
  0x5e   : > { %462 = dma.vmem_to_hbm [thread:$0]  (%p757_p9), %s331_s26, 128, %s333_s19, %s318_s12  }
  0x5f PF: > { %s344_s3 = sand.u32 1, %s666_s9   ;;  %p472_p0 = pnand %p440_p12, %p764_p11 }
  0x60   : > { %s345_s25 = scalar_lea.sflag [#allocation4], %s344_s3 }
  0x61   : > { %p473_p1 = pneg %p472_p0 }
  0x63   : > { %661 = dma.done.wait (%p473_p1), %s345_s25, 128  }
  0x64   : > { %663 = vsyncadd (%p473_p1), %s345_s25, 4294967168  ;;  %s21_s14 = sadd.s32 1, %s686_s14   ;;  %s865_s9 = smov %s670_s10 }
  0x65   : > { %p18_p2 = scmp.ge.s32.totalorder %s21_s14, 4   ;;  %s866_s10 = smov %s674_s11 }
  0x66   : > { %s867_s11 = smov %s762_s23  ;;  %s868_s12 = smov %s682_s13 }
  0x67   : > { %s869_s13 = smov %s871_s17  ;;  %20 = sbr.rel (!%p18_p2) target bundleno = 8 (0x8), region = 101 }
  0x6c   :  { %351 = vsyncpa [#allocation3], 1 }
  0x6d   :  { %353 = vsyncpa [#allocation3 + $0x1], 1 }
  0x6e   :  { %354 = vsyncpa [#allocation6], 1 }
  0x6f   :  { %356 = vsyncpa [#allocation6 + $0x1], 1 }
  0x70   :  { %357 = vsyncpa [#allocation4], 1 }
  0x71   :  { %359 = vsyncpa [#allocation4 + $0x1], 1 }

</bundles_post_ra>
